<compile_context>
chip_gen: v7x
topology: tpu7x:2x2x1
jax: 0.10.0
libtpu: 0.0.40
codegen_flags: <defaults>
</compile_context>

<pallas_src>
import jax
import jax.numpy as jnp
from jax.experimental import pallas as pl
from jax.experimental.pallas import tpu as pltpu

HIDDEN = 300          # fc1 output / LayerNorm width (nn.Linear(state_dim, 300))
H_PAD = 384           # lane-aligned hidden width (3 * 128)
LN_EPS = 1e-5         # torch.nn.LayerNorm default eps
NEG_BIG = -1e30       # bias for padded action lanes -> exp() underflows to 0


def _round_up(x, m):
    return (x + m - 1) // m * m


def actor_kernel(s_ref, w1_ref, bias_ref, w2_ref, b2_ref, out_ref):
    # fc1 (MXU, bf16 in / f32 accumulate). s is cast to bf16 in-kernel.
    s = s_ref[...].astype(jnp.bfloat16)
    h = jnp.dot(s, w1_ref[...], preferred_element_type=jnp.float32)

    bias = bias_ref[...]                 # (3, H_PAD) f32: rows = b1, gamma, beta
    b1 = bias[0:1, :]
    gamma = bias[1:2, :]
    beta = bias[2:3, :]

    h = jnp.maximum(h + b1, 0.0)         # bias + relu (f32 on VPU)

    # LayerNorm over the real 300 lanes. Padded lanes are exactly 0 after relu
    # (zero w1 cols / b1 entries), so sums over 384 lanes == sums over 300;
    # single fused pass: sum and sum-of-squares.
    inv_n = 1.0 / HIDDEN
    s1 = jnp.sum(h, axis=-1, keepdims=True)
    s2 = jnp.sum(h * h, axis=-1, keepdims=True)
    mean = s1 * inv_n
    var = jnp.maximum(s2 * inv_n - mean * mean, 0.0)
    hn = (h - mean) * jax.lax.rsqrt(var + LN_EPS)
    hn = hn * gamma + beta               # padded gamma/beta are 0 -> hn pad = 0

    # fc2 (MXU, bf16 in / f32 accumulate); padded w2 rows are 0 -> no leakage.
    logits = jnp.dot(hn.astype(jnp.bfloat16), w2_ref[...],
                     preferred_element_type=jnp.float32)
    logits = logits + b2_ref[...]        # padded b2 lanes are -1e30

    # numerically stable softmax; padded lanes give exp(-huge) = 0 exactly,
    # so the real columns match the unpadded softmax. reciprocal on the EUP
    # plus one Newton step for ~f32 accuracy.
    m = jnp.max(logits, axis=-1, keepdims=True)
    e = jnp.exp(logits - m)
    denom = jnp.sum(e, axis=-1, keepdims=True)
    inv = pl.reciprocal(denom, approx=True)
    inv = inv * (2.0 - denom * inv)
    out_ref[...] = e * inv


def _pad_last(x, target):
    pad = target - x.shape[-1]
    return jnp.pad(x, [(0, 0)] * (x.ndim - 1) + [(0, pad)])


def prepare_params(w1, b1, gamma, beta, w2, b2):
    """One-time parameter prep: lane-pad, fuse, and cast MXU operands to bf16.

    Call once (outside the hot path); the result is reused by every forward.
    """
    A = w2.shape[1]
    a_pad = max(128, _round_up(A, 128))          # lane-dense output width

    w1_p = _pad_last(w1, H_PAD).astype(jnp.bfloat16)             # (S, 384) bf16
    bias3 = jnp.concatenate(
        [_pad_last(b1, H_PAD),                                    # row 0: b1
         _pad_last(gamma, H_PAD),                                 # row 1: gamma
         _pad_last(beta, H_PAD)], axis=0).astype(jnp.float32)     # row 2: beta
    w2_p = jnp.pad(w2, ((0, H_PAD - HIDDEN), (0, a_pad - A))
                   ).astype(jnp.bfloat16)                         # (384, a_pad)
    b2_p = jnp.pad(b2, ((0, 0), (0, a_pad - A)),
                   constant_values=NEG_BIG).astype(jnp.float32)   # (1, a_pad)
    return dict(w1=w1_p, bias=bias3, w2=w2_p, b2=b2_p, action_dim=A)


def actor_forward(s, params, *, batch_tile=512):
    """s: (B, state_dim) float32 -> (B, action_dim) softmax probs (float32)."""
    B, S = s.shape
    A = params["action_dim"]
    a_pad = params["w2"].shape[1]

    # adaptive batch tiling: multiples of 8 sublanes, <= batch_tile rows/tile,
    # >= 2 tiles for non-tiny batches so the parallel axis can split across
    # both v7x TensorCores with minimal padding waste.
    b_round = _round_up(B, 8)
    n_tiles = max(pl.cdiv(b_round, batch_tile), 2 if b_round >= 16 else 1)
    tb = _round_up(pl.cdiv(b_round, n_tiles), 8)
    b_pad = n_tiles * tb

    # Only the state batch is padded per call (rows are independent, sliced
    # off at the end). No weight padding / casting in the hot path.
    s_p = jnp.pad(s, ((0, b_pad - B), (0, 0)))                    # f32

    out = pl.pallas_call(
        actor_kernel,
        out_shape=jax.ShapeDtypeStruct((b_pad, a_pad), jnp.float32),
        grid=(n_tiles,),
        in_specs=[
            pl.BlockSpec((tb, S), lambda i: (i, 0)),        # s tile (pipelined)
            pl.BlockSpec((S, H_PAD), lambda i: (0, 0)),     # w1 (resident)
            pl.BlockSpec((3, H_PAD), lambda i: (0, 0)),     # b1/gamma/beta fused
            pl.BlockSpec((H_PAD, a_pad), lambda i: (0, 0)), # w2 (resident)
            pl.BlockSpec((1, a_pad), lambda i: (0, 0)),     # b2 (padded -1e30)
        ],
        out_specs=pl.BlockSpec((tb, a_pad), lambda i: (i, 0)),
        compiler_params=pltpu.CompilerParams(
            dimension_semantics=("parallel",)),             # megacore on v7x
    )(s_p, params["w1"], params["bias"], params["w2"], params["b2"])
    return out[:B, :A]


def init_params(key, state_dim, action_dim):
    """Deterministic synthetic parameters (shapes from Actor.__init__), f32."""
    k1, k2, k3, k4 = jax.random.split(key, 4)
    w1 = jax.random.normal(k1, (state_dim, HIDDEN), jnp.float32) * (1.0 / jnp.sqrt(state_dim))
    b1 = jax.random.normal(k2, (1, HIDDEN), jnp.float32) * 0.01
    gamma = jnp.ones((1, HIDDEN), jnp.float32)       # nn.LayerNorm weight init
    beta = jnp.zeros((1, HIDDEN), jnp.float32)       # nn.LayerNorm bias init
    w2 = jax.random.normal(k3, (HIDDEN, action_dim), jnp.float32) * (1.0 / jnp.sqrt(HIDDEN))
    b2 = jax.random.normal(k4, (1, action_dim), jnp.float32) * 0.01
    return w1, b1, gamma, beta, w2, b2


def reference_forward(s, w1, b1, gamma, beta, w2, b2):
    """Pure-JAX reference with the same bf16 MXU feed (f32 everything else)."""
    q = lambda x: x.astype(jnp.bfloat16).astype(jnp.float32)
    h = jnp.maximum(q(s) @ q(w1) + b1, 0.0)
    mean = jnp.mean(h, axis=-1, keepdims=True)
    var = jnp.mean((h - mean) ** 2, axis=-1, keepdims=True)
    hn = (h - mean) / jnp.sqrt(var + LN_EPS) * gamma + beta
    return jax.nn.softmax(q(hn) @ q(w2) + b2, axis=-1)


if __name__ == "__main__":
    key = jax.random.PRNGKey(0)
    k_s, k_b, k_p = jax.random.split(key, 3)

    state_dim = 32
    action_dim = 8
    raw_params = init_params(k_p, state_dim, action_dim)
    params = jax.tree_util.tree_map(jax.block_until_ready,
                                    prepare_params(*raw_params))

    # small case (matches the module's typical single-state / tiny batch use)
    batch = 2
    s_small = jax.random.normal(k_s, (batch, state_dim), jnp.float32)
    out_small = jax.block_until_ready(actor_forward(s_small, params))
    ref_small = reference_forward(s_small, *raw_params)
    assert out_small.shape == (batch, action_dim)
    assert jnp.allclose(out_small, ref_small, atol=1e-3, rtol=1e-3), "mismatch (small batch)"
    assert jnp.allclose(jnp.sum(out_small, axis=-1), 1.0, atol=1e-4), "softmax rows must sum to 1"

    # batched RL-step case: exercises the row-tiled grid (2 snug tiles of 136
    # rows, splittable across both v7x TensorCores) + batch padding
    big_batch = 260
    s_big = jax.random.normal(k_b, (big_batch, state_dim), jnp.float32)
    out_big = jax.block_until_ready(actor_forward(s_big, params, batch_tile=512))
    ref_big = reference_forward(s_big, *raw_params)
    assert out_big.shape == (big_batch, action_dim)
    assert jnp.allclose(out_big, ref_big, atol=1e-3, rtol=1e-3), "mismatch (big batch)"
    assert jnp.allclose(jnp.sum(out_big, axis=-1), 1.0, atol=1e-4), "softmax rows must sum to 1"

    print("KERNEL_OK")
</pallas_src>

<mosaic_0001>
module attributes {stable_mosaic.version = 11 : i64} {
  func.func @actor_kernel(%arg0: i32, %arg1: memref<8x32xf32, #tpu.memory_space<vmem>>, %arg2: memref<32x384xbf16, #tpu.memory_space<vmem>>, %arg3: memref<3x384xf32, #tpu.memory_space<vmem>>, %arg4: memref<384x128xbf16, #tpu.memory_space<vmem>>, %arg5: memref<1x128xf32, #tpu.memory_space<vmem>>, %arg6: memref<8x128xf32, #tpu.memory_space<vmem>>) attributes {dimension_semantics = [#tpu.dimension_semantics<parallel>], iteration_bounds = array<i64: 1>, scalar_prefetch = 0 : i64, scratch_operands = 0 : i64, tpu.core_type = #tpu.core_type<tc>, window_params = [{transform_indices = @transform_0, window_bounds = array<i64: 8, 32>}, {pipeline_mode = #tpu.pipeline_mode<synchronous>, transform_indices = @transform_1, window_bounds = array<i64: 32, 384>}, {pipeline_mode = #tpu.pipeline_mode<synchronous>, transform_indices = @transform_2, window_bounds = array<i64: 3, 384>}, {pipeline_mode = #tpu.pipeline_mode<synchronous>, transform_indices = @transform_3, window_bounds = array<i64: 384, 128>}, {pipeline_mode = #tpu.pipeline_mode<synchronous>, transform_indices = @transform_4, window_bounds = array<i64: 1, 128>}, {transform_indices = @transform_5, window_bounds = array<i64: 8, 128>}]} {
    %c0 = arith.constant 0 : index
    %c0_0 = arith.constant 0 : index
    %0 = vector.load %arg1[%c0, %c0_0] : memref<8x32xf32, #tpu.memory_space<vmem>>, vector<8x32xf32>
    %1 = arith.truncf %0 : vector<8x32xf32> to vector<8x32xbf16>
    %c0_1 = arith.constant 0 : index
    %c0_2 = arith.constant 0 : index
    %2 = vector.load %arg2[%c0_1, %c0_2] : memref<32x384xbf16, #tpu.memory_space<vmem>>, vector<32x384xbf16>
    %cst = arith.constant dense<0.000000e+00> : vector<8x384xf32>
    %3 = tpu.matmul %1, %2, %cst {dimension_numbers = #tpu.dot_dimension_numbers<[1], [0], [0], [1], [0, 0, 1, 1], [], []>} : vector<8x32xbf16>, vector<32x384xbf16>, vector<8x384xf32> -> vector<8x384xf32>
    %c0_3 = arith.constant 0 : index
    %c0_4 = arith.constant 0 : index
    %4 = vector.load %arg3[%c0_3, %c0_4] : memref<3x384xf32, #tpu.memory_space<vmem>>, vector<3x384xf32>
    %5 = vector.extract_strided_slice %4 {offsets = [0, 0], sizes = [1, 384], strides = [1, 1]} : vector<3x384xf32> to vector<1x384xf32>
    %6 = vector.extract_strided_slice %4 {offsets = [1, 0], sizes = [1, 384], strides = [1, 1]} : vector<3x384xf32> to vector<1x384xf32>
    %7 = vector.extract_strided_slice %4 {offsets = [2, 0], sizes = [1, 384], strides = [1, 1]} : vector<3x384xf32> to vector<1x384xf32>
    %8 = vector.broadcast %5 : vector<1x384xf32> to vector<8x384xf32>
    %9 = arith.addf %3, %8 : vector<8x384xf32>
    %cst_5 = arith.constant 0.000000e+00 : f32
    %10 = vector.broadcast %cst_5 : f32 to vector<8x384xf32>
    %11 = arith.maximumf %9, %10 : vector<8x384xf32>
    %cst_6 = arith.constant dense<0.000000e+00> : vector<8xf32>
    %12 = vector.multi_reduction <add>, %11, %cst_6 [1] : vector<8x384xf32> to vector<8xf32>
    %13 = vector.shape_cast %12 : vector<8xf32> to vector<8x1xf32>
    %14 = arith.mulf %11, %11 : vector<8x384xf32>
    %cst_7 = arith.constant dense<0.000000e+00> : vector<8xf32>
    %15 = vector.multi_reduction <add>, %14, %cst_7 [1] : vector<8x384xf32> to vector<8xf32>
    %16 = vector.shape_cast %15 : vector<8xf32> to vector<8x1xf32>
    %cst_8 = arith.constant 0.00333333341 : f32
    %17 = vector.broadcast %cst_8 : f32 to vector<8x1xf32>
    %18 = arith.mulf %13, %17 : vector<8x1xf32>
    %cst_9 = arith.constant 0.00333333341 : f32
    %19 = vector.broadcast %cst_9 : f32 to vector<8x1xf32>
    %20 = arith.mulf %16, %19 : vector<8x1xf32>
    %21 = arith.mulf %18, %18 : vector<8x1xf32>
    %22 = arith.subf %20, %21 : vector<8x1xf32>
    %cst_10 = arith.constant 0.000000e+00 : f32
    %23 = vector.broadcast %cst_10 : f32 to vector<8x1xf32>
    %24 = arith.maximumf %22, %23 : vector<8x1xf32>
    %25 = vector.broadcast %18 : vector<8x1xf32> to vector<8x384xf32>
    %26 = arith.subf %11, %25 : vector<8x384xf32>
    %cst_11 = arith.constant 9.99999974E-6 : f32
    %27 = vector.broadcast %cst_11 : f32 to vector<8x1xf32>
    %28 = arith.addf %24, %27 : vector<8x1xf32>
    %29 = math.rsqrt %28 : vector<8x1xf32>
    %30 = vector.broadcast %29 : vector<8x1xf32> to vector<8x384xf32>
    %31 = arith.mulf %26, %30 : vector<8x384xf32>
    %32 = vector.broadcast %6 : vector<1x384xf32> to vector<8x384xf32>
    %33 = arith.mulf %31, %32 : vector<8x384xf32>
    %34 = vector.broadcast %7 : vector<1x384xf32> to vector<8x384xf32>
    %35 = arith.addf %33, %34 : vector<8x384xf32>
    %36 = arith.truncf %35 : vector<8x384xf32> to vector<8x384xbf16>
    %c0_12 = arith.constant 0 : index
    %c0_13 = arith.constant 0 : index
    %37 = vector.load %arg4[%c0_12, %c0_13] : memref<384x128xbf16, #tpu.memory_space<vmem>>, vector<384x128xbf16>
    %cst_14 = arith.constant dense<0.000000e+00> : vector<8x128xf32>
    %38 = tpu.matmul %36, %37, %cst_14 {dimension_numbers = #tpu.dot_dimension_numbers<[1], [0], [0], [1], [0, 0, 1, 1], [], []>} : vector<8x384xbf16>, vector<384x128xbf16>, vector<8x128xf32> -> vector<8x128xf32>
    %c0_15 = arith.constant 0 : index
    %c0_16 = arith.constant 0 : index
    %39 = vector.load %arg5[%c0_15, %c0_16] : memref<1x128xf32, #tpu.memory_space<vmem>>, vector<1x128xf32>
    %40 = vector.broadcast %39 : vector<1x128xf32> to vector<8x128xf32>
    %41 = arith.addf %38, %40 : vector<8x128xf32>
    %cst_17 = arith.constant dense<0xFF800000> : vector<8xf32>
    %42 = vector.multi_reduction <maximumf>, %41, %cst_17 [1] : vector<8x128xf32> to vector<8xf32>
    %43 = vector.shape_cast %42 : vector<8xf32> to vector<8x1xf32>
    %44 = vector.broadcast %43 : vector<8x1xf32> to vector<8x128xf32>
    %45 = arith.subf %41, %44 : vector<8x128xf32>
    %46 = math.exp %45 : vector<8x128xf32>
    %cst_18 = arith.constant dense<0.000000e+00> : vector<8xf32>
    %47 = vector.multi_reduction <add>, %46, %cst_18 [1] : vector<8x128xf32> to vector<8xf32>
    %48 = vector.shape_cast %47 : vector<8xf32> to vector<8x1xf32>
    %49 = tpu.reciprocal %48 {approx = true} : vector<8x1xf32> -> vector<8x1xf32>
    %50 = arith.mulf %48, %49 : vector<8x1xf32>
    %cst_19 = arith.constant 2.000000e+00 : f32
    %51 = vector.broadcast %cst_19 : f32 to vector<8x1xf32>
    %52 = arith.subf %51, %50 : vector<8x1xf32>
    %53 = arith.mulf %49, %52 : vector<8x1xf32>
    %54 = vector.broadcast %53 : vector<8x1xf32> to vector<8x128xf32>
    %55 = arith.mulf %46, %54 : vector<8x128xf32>
    %c0_20 = arith.constant 0 : index
    %c0_21 = arith.constant 0 : index
    %56 = vector.load %arg6[%c0_20, %c0_21] : memref<8x128xf32, #tpu.memory_space<vmem>>, vector<8x128xf32>
    tpu.vector_store %arg6[%c0_20, %c0_21], %55 {strides = array<i32>} : memref<8x128xf32, #tpu.memory_space<vmem>>, vector<8x128xf32>,
    return
  }
  func.func @transform_0(%arg0: i32) -> (i32, i32) {
    %c0_i32 = arith.constant 0 : i32
    %c0_i32_0 = arith.constant 0 : i32
    return %arg0, %c0_i32 : i32, i32
  }
  func.func @transform_1(%arg0: i32) -> (i32, i32) {
    %c0_i32 = arith.constant 0 : i32
    %c0_i32_0 = arith.constant 0 : i32
    %c0_i32_1 = arith.constant 0 : i32
    return %c0_i32, %c0_i32_0 : i32, i32
  }
  func.func @transform_2(%arg0: i32) -> (i32, i32) {
    %c0_i32 = arith.constant 0 : i32
    %c0_i32_0 = arith.constant 0 : i32
    %c0_i32_1 = arith.constant 0 : i32
    return %c0_i32, %c0_i32_0 : i32, i32
  }
  func.func @transform_3(%arg0: i32) -> (i32, i32) {
    %c0_i32 = arith.constant 0 : i32
    %c0_i32_0 = arith.constant 0 : i32
    %c0_i32_1 = arith.constant 0 : i32
    return %c0_i32, %c0_i32_0 : i32, i32
  }
  func.func @transform_4(%arg0: i32) -> (i32, i32) {
    %c0_i32 = arith.constant 0 : i32
    %c0_i32_0 = arith.constant 0 : i32
    %c0_i32_1 = arith.constant 0 : i32
    return %c0_i32, %c0_i32_0 : i32, i32
  }
  func.func @transform_5(%arg0: i32) -> (i32, i32) {
    %c0_i32 = arith.constant 0 : i32
    %c0_i32_0 = arith.constant 0 : i32
    return %arg0, %c0_i32 : i32, i32
  }
}

</mosaic_0001>

<bundles_post_ra>
// kernel: tpu_custom_call.1
= control target key start
LH: loop header
LB: loop body
LE: loop exit
PB: predicated region body
PF: predicated region fallthrough
CT: control target
= control target key end

     0   :  { %10 = vsyncpa [#allocation3], 0  ;;  %s1051_s0 = inlined_call_operand.hbm [shape: f32[8,32], index: 0, kind: input, shape index: {}]   ;;  %s1052_s1 = inlined_call_operand.hbm [shape: bf16[32,384], index: 1, kind: input, shape index: {}]   ;;  %s1053_s2 = inlined_call_operand.hbm [shape: f32[3,384], index: 2, kind: input, shape index: {}]   ;;  %s1054_s3 = inlined_call_operand.hbm [shape: bf16[384,128], index: 3, kind: input, shape index: {}]   ;;  %s1055_s4 = inlined_call_operand.vmem [shape: f32[1,128], index: 4, kind: input, shape index: {}]   ;;  %s1056_s5 = inlined_call_operand.hbm [shape: f32[8,128], index: 5, kind: output, shape index: {}]  }
   0x1   :  { %11 = vsyncpa [#allocation6], 0 }
   0x2   :  { %12 = vsyncpa [#allocation9], 0 }
   0x3   :  { %13 = vsyncpa [#allocation4], 0  ;;  %s893_s18 = smov [#allocation5]   ;;  %s775_s22 = scalar_lea.hbm %s1052_s1, 768 }
   0x4   :  { %s29_s19 = sshll.u32 %s893_s18, 4  ;;  %p776_p0 = scmp.ne.s32.totalorder %s1052_s1, %s775_s22  ;;  %s30_s19 = int_to_ptr.vmem [resolvable:$true] %s29_s19 }
   0x5   :  { %p779_p1 = scmp.lt.u32.totalorder %s775_s22, %s1052_s1 }
   0x7   :  { %p781_p2 = pnand %p779_p1, %p776_p0 }
   0x9   :  { %784 = shalt.err (!%p781_p2)
}
   0xa   :  { %s785_s27 = scalar_lea.vmem %s30_s19, 768  ;;  %p790_p4 = scmp.lt.s32.totalorder %s30_s19, %s30_s19 }
   0xb   :  { %p786_p3 = scmp.ne.s32.totalorder %s30_s19, %s785_s27  ;;  %p791_p5 = scmp.lt.s32.totalorder %s785_s27, %s785_s27 }
   0xd   :  { %p792_p6 = por %p791_p5, %p790_p4 }
   0xf   :  { %p793_p7 = pnand %p792_p6, %p786_p3 }
  0x11   :  { %796 = shalt.err (!%p793_p7)
}
  0x12   :  { %s894_s28 = smov 192   ;;  %s895_s29 = smov 12  }
  0x13   :  { %35 = dma.hbm_to_vmem [thread:$0]  %s1052_s1, 768, %s30_s19, [#allocation6], %s894_s28, %s894_s28, %s895_s29  }
  0x14   :  { %s896_s7 = smov [#allocation2]   ;;  %s897_s9 = smov [#allocation7]  }
  0x15   :  { %s20_s8 = sshll.u32 %s896_s7, 4  ;;  %s42_s10 = sshll.u32 %s897_s9, 4  ;;  %s21_s8 = int_to_ptr.vmem [resolvable:$true] %s20_s8  ;;  %s43_s10 = int_to_ptr.vmem [resolvable:$true] %s42_s10 }
  0x16   :  { %s797_s13 = scalar_lea.hbm %s1051_s0, 128 }
  0x17   :  { %p798_p8 = scmp.ne.s32.totalorder %s1051_s0, %s797_s13  ;;  %p801_p9 = scmp.lt.u32.totalorder %s797_s13, %s1051_s0 }
  0x19   :  { %p803_p10 = pnand %p801_p9, %p798_p8 }
  0x1b   :  { %806 = shalt.err (!%p803_p10)
}
  0x1c   :  { %s807_s1 = scalar_lea.vmem %s21_s8, 128  ;;  %p812_p12 = scmp.lt.s32.totalorder %s21_s8, %s21_s8 }
  0x1d   :  { %p808_p11 = scmp.ne.s32.totalorder %s21_s8, %s807_s1  ;;  %p813_p13 = scmp.lt.s32.totalorder %s807_s1, %s807_s1 }
  0x1f   :  { %p814_p0 = por %p813_p13, %p812_p12 }
  0x21   :  { %p815_p1 = pnand %p814_p0, %p808_p11 }
  0x23   :  { %818 = shalt.err (!%p815_p1)
}
  0x24   :  { %23 = dma.hbm_to_vmem [thread:$0]  %s1051_s0, 128, %s21_s8, [#allocation3]  }
  0x25   :  { %s819_s22 = scalar_lea.hbm %s1053_s2, 192 }
  0x26   :  { %p820_p2 = scmp.ne.s32.totalorder %s1053_s2, %s819_s22  ;;  %p823_p3 = scmp.lt.u32.totalorder %s819_s22, %s1053_s2 }
  0x28   :  { %p825_p4 = pnand %p823_p3, %p820_p2 }
  0x2a   :  { %828 = shalt.err (!%p825_p4)
}
  0x2b   :  { %s829_s27 = scalar_lea.vmem %s43_s10, 192  ;;  %p834_p6 = scmp.lt.s32.totalorder %s43_s10, %s43_s10 }
  0x2c   :  { %p830_p5 = scmp.ne.s32.totalorder %s43_s10, %s829_s27  ;;  %p835_p7 = scmp.lt.s32.totalorder %s829_s27, %s829_s27 }
  0x2e   :  { %p836_p8 = por %p835_p7, %p834_p6 }
  0x30   :  { %p837_p9 = pnand %p836_p8, %p830_p5 }
  0x32   :  { %840 = shalt.err (!%p837_p9)
}
  0x33   :  { %45 = dma.hbm_to_vmem [thread:$0]  %s1053_s2, 192, %s43_s10, [#allocation6]  }
  0x34   :  { %s898_s29 = smov [#allocation8]   ;;  %s841_s8 = scalar_lea.hbm %s1054_s3, 3072 }
  0x35   :  { %s51_s30 = sshll.u32 %s898_s29, 4  ;;  %p842_p10 = scmp.ne.s32.totalorder %s1054_s3, %s841_s8  ;;  %s52_s30 = int_to_ptr.vmem [resolvable:$true] %s51_s30 }
  0x36   :  { %p845_p11 = scmp.lt.u32.totalorder %s841_s8, %s1054_s3 }
  0x38   :  { %p847_p12 = pnand %p845_p11, %p842_p10 }
  0x3a   :  { %850 = shalt.err (!%p847_p12)
}
  0x3b   :  { %s851_s14 = scalar_lea.vmem %s52_s30, 3072  ;;  %p856_p0 = scmp.lt.s32.totalorder %s52_s30, %s52_s30 }
  0x3c   :  { %p852_p13 = scmp.ne.s32.totalorder %s52_s30, %s851_s14  ;;  %p857_p1 = scmp.lt.s32.totalorder %s851_s14, %s851_s14 }
  0x3e   :  { %p858_p2 = por %p857_p1, %p856_p0 }
  0x40   :  { %p859_p3 = pnand %p858_p2, %p852_p13 }
  0x42   :  { %862 = shalt.err (!%p859_p3)
}
  0x43   :  { %s899_s2 = smov 64   ;;  %s900_s10 = smov 4  }
  0x44   :  { %57 = dma.hbm_to_vmem [thread:$0]  %s1054_s3, 3072, %s52_s30, [#allocation9], %s899_s2, %s899_s2, %s900_s10  }
  0x45   :  { %885 = dma.done.wait [#allocation3], 128  }
  0x46   :  { %886 = vsyncadd [#allocation3], 4294967168 }
  0x47   :  { %887 = dma.done.wait [#allocation6], 960  }
  0x48   :  { %888 = vsyncadd [#allocation6], 4294966336 }
  0x49   :  { %889 = dma.done.wait [#allocation9], 3072  }
  0x4a   :  { %890 = vsyncadd [#allocation9], 4294964224  ;;  %v901_v0 = vmov 0.0   ;;  %v902_v1 = vmov 0   ;;  %vm903_vm0 = vmmov 0   ;;  %v73_v8 = vld [vmem:[#allocation2] sm:$0xff]  ;;  %v87_v10 = vlaneseq }
  0x4b   :  { %697 = vmatprep.subr.bf16.mxu1 %v901_v0  ;;  %182 = vmatprep.mubr.bf16.mxu0 %v902_v1  ;;  %v737_v2 = vld [vmem:[#allocation5 + $0x4] ss:$12 sps:$4 sm:$0xff]   ;;  %v739_v3 = vld [vmem:[#allocation5] ss:$12 sps:$4 sm:$0xff]   ;;  %v740_v4 = vld [vmem:[#allocation5 + $0x8] ss:$12 sps:$4 sm:$0xff]   ;;  %v74_v9 = vpack.c.bf16 %v73_v8, %v73_v8 }
  0x4c   :  { %701 = vmatprep.mubr.msk.bf16.mxu1 %vm903_vm0, %v901_v0  ;;  %150 = vmatprep.subr.bf16.mxu0 %v737_v2  ;;  %v741_v5 = vld [vmem:[#allocation5 + $0x1c] ss:$12 sps:$4 sm:$0xff]   ;;  %v743_v6 = vld [vmem:[#allocation5 + $0x18] ss:$12 sps:$4 sm:$0xff]   ;;  %v744_v7 = vld [vmem:[#allocation5 + $0x20] ss:$12 sps:$4 sm:$0xff]  }
  0x4d   :  { %151 = vmatpush1.bf16.msra.mxu0 %v739_v3  ;;  %698 = vmatpush3.bf16.msra.mxu1 %v740_v4  ;;  %vm146_vm1 = vcmask 261120   ;;  %v990_v11 = vshrl.u32 %v87_v10, 7  ;;  %v993_v13 = vld [vmem:[#allocation7] sm:$0x77]  ;;  %v996_v15 = vld [vmem:[#allocation7 + $0x8] sm:$0x7] }
  0x4e   :  { %152 = vmatprep.subr.bf16.mxu0 %v741_v5  ;;  %699 = vmatprep.subr.bf16.mxu1 %v901_v0  ;;  %v745_v43 = vld [vmem:[#allocation8 + $0x40] sm:$0xff]   ;;  %v748_v46 = vld [vmem:[#allocation8 + $0x48] sm:$0xff]   ;;  %v751_v49 = vld [vmem:[#allocation8 + $0x50] sm:$0xff]  }
  0x4f   :  { %v89_v12 = vsub.s32 0, %v990_v11  ;;  %v93_v14 = vsub.s32 4, %v990_v11  ;;  %v746_v44 = vld [vmem:[#allocation8 + $0x80] sm:$0xff]   ;;  %v749_v47 = vld [vmem:[#allocation8 + $0x88] sm:$0xff]   ;;  %v752_v50 = vld [vmem:[#allocation8 + $0x90] sm:$0xff]  }
  0x50   :  { %v747_v45 = vld [vmem:[#allocation8] sm:$0xff]   ;;  %v750_v48 = vld [vmem:[#allocation8 + $0x8] sm:$0xff]   ;;  %v753_v51 = vld [vmem:[#allocation8 + $0x10] sm:$0xff]  }
  0x51   :  { %153 = vmatpush1.bf16.msra.mxu0 %v743_v6  ;;  %700 = vmatpush3.bf16.msra.mxu1 %v744_v7  ;;  %v90_v16 = vrot.slane %v993_v13, %v89_v12  ;;  %v98_v17 = vrot.slane %v996_v15, %v89_v12  ;;  %v94_v18 = vrot.slane %v993_v13, %v93_v14  ;;  %v754_v52 = vld [vmem:[#allocation8 + $0x58] sm:$0xff]   ;;  %v757_v55 = vld [vmem:[#allocation8 + $0x60] sm:$0xff]   ;;  %v760_v58 = vld [vmem:[#allocation8 + $0x68] sm:$0xff]   ;;  %v260_v14 = vsub.s32 1, %v990_v11 }
  0x52   :  { %705 = vmatprep.subr.bf16.mxu1 %v901_v0  ;;  %666 = vmatprep.subr.bf16.mxu0 %v745_v43  ;;  %v755_v53 = vld [vmem:[#allocation8 + $0x98] sm:$0xff]   ;;  %v758_v56 = vld [vmem:[#allocation8 + $0xa0] sm:$0xff]   ;;  %v761_v59 = vld [vmem:[#allocation8 + $0xa8] sm:$0xff]  }
  0x53   :  { %v105_v19 = vrot.slane %v90_v16, %v89_v12  ;;  %v113_v20 = vrot.slane %v98_v17, %v89_v12  ;;  %v109_v21 = vrot.slane %v94_v18, %v89_v12  ;;  %v756_v54 = vld [vmem:[#allocation8 + $0x18] sm:$0xff]   ;;  %v759_v57 = vld [vmem:[#allocation8 + $0x20] sm:$0xff]   ;;  %v762_v60 = vld [vmem:[#allocation8 + $0x28] sm:$0xff]   ;;  %v264_v16 = vsub.s32 5, %v990_v11 }
  0x54   :  { %636 = vmatmul.mubr.msk.bf16.vlgmr.msra.gmra.mrb[0].mxu0 %vm146_vm1, %v74_v9  ;;  %702 = vmatmul.mubr.msk.bf16.vlgmr.msra.gmra.mrb[0].mxu1 %vm146_vm1, %v74_v9  ;;  %v763_v61 = vld [vmem:[#allocation8 + $0x70] sm:$0xff]   ;;  %v766_v1 = vld [vmem:[#allocation8 + $0x78] sm:$0xff]   ;;  %v290_v17 = vsub.s32 2, %v990_v11  ;;  %v269_v18 = vrot.slane %v996_v15, %v260_v14 }
  0x55   :  { %721 = vmatprep.mubr.msk.bf16.mxu1 %vm903_vm0, %v901_v0  ;;  %706 = vmatpush3.bf16.msra.mxu1 %v746_v44  ;;  %v764_v62 = vld [vmem:[#allocation8 + $0xb0] sm:$0xff]   ;;  %v767_v2 = vld [vmem:[#allocation8 + $0xb8] sm:$0xff]  }
  0x56   :  { %667 = vmatpush3.bf16.msra.mxu0 %v747_v45  ;;  %707 = vmatprep.subr.bf16.mxu1 %v901_v0  ;;  %v765_v63 = vld [vmem:[#allocation8 + $0x30] sm:$0xff]   ;;  %v768_v3 = vld [vmem:[#allocation8 + $0x38] sm:$0xff]  }
  0x57   :  { %668 = vmatprep.subr.bf16.mxu0 %v748_v46  ;;  %v638_v46 = vld [vmem:[%s1055_s4] ss:$0 sm:$0xff]  ;;  %s904_s4 = smov [#allocation10]  }
  0x58   :  { %s619_s1 = sshll.u32 %s904_s4, 4  ;;  %s620_s1 = int_to_ptr.vmem [resolvable:$true] %s619_s1 }
  0x59   :  { %708 = vmatpush3.bf16.msra.mxu1 %v749_v47  ;;  %s863_s18 = scalar_lea.vmem %s620_s1, 128  ;;  %p868_p5 = scmp.lt.s32.totalorder %s620_s1, %s620_s1 }
  0x5a   :  { %669 = vmatpush3.bf16.msra.mxu0 %v750_v48  ;;  %709 = vmatprep.subr.bf16.mxu1 %v901_v0  ;;  %p864_p4 = scmp.ne.s32.totalorder %s620_s1, %s863_s18  ;;  %p869_p6 = scmp.lt.s32.totalorder %s863_s18, %s863_s18 }
  0x5b   :  { %670 = vmatprep.subr.bf16.mxu0 %v751_v49 }
  0x5c   :  { %p870_p7 = por %p869_p6, %p868_p5 }
  0x5d   :  { %710 = vmatpush3.bf16.msra.mxu1 %v752_v50 }
  0x5e   :  { %671 = vmatpush3.bf16.msra.mxu0 %v753_v51  ;;  %711 = vmatprep.subr.bf16.mxu1 %v901_v0  ;;  %p871_p8 = pnand %p870_p7, %p864_p4 }
  0x5f   :  { %672 = vmatprep.subr.bf16.mxu0 %v754_v52 }
  0x61   :  { %712 = vmatpush3.bf16.msra.mxu1 %v755_v53 }
  0x62   :  { %673 = vmatpush3.bf16.msra.mxu0 %v756_v54  ;;  %713 = vmatprep.subr.bf16.mxu1 %v901_v0 }
  0x63   :  { %674 = vmatprep.subr.bf16.mxu0 %v757_v55 }
  0x65   :  { %714 = vmatpush3.bf16.msra.mxu1 %v758_v56 }
  0x66   :  { %675 = vmatpush3.bf16.msra.mxu0 %v759_v57  ;;  %715 = vmatprep.subr.bf16.mxu1 %v901_v0 }
  0x67   :  { %676 = vmatprep.subr.bf16.mxu0 %v760_v58 }
  0x69   :  { %716 = vmatpush3.bf16.msra.mxu1 %v761_v59 }
  0x6a   :  { %677 = vmatpush3.bf16.msra.mxu0 %v762_v60  ;;  %717 = vmatprep.subr.bf16.mxu1 %v901_v0 }
  0x6b   :  { %678 = vmatprep.subr.bf16.mxu0 %v763_v61 }
  0x6d   :  { %718 = vmatpush3.bf16.msra.mxu1 %v764_v62 }
  0x6e   :  { %679 = vmatpush3.bf16.msra.mxu0 %v765_v63  ;;  %719 = vmatprep.subr.bf16.mxu1 %v901_v0  ;;  %v294_v0 = vsub.s32 6, %v990_v11 }
  0x6f   :  { %680 = vmatprep.subr.bf16.mxu0 %v766_v1 }
  0x71   :  { %720 = vmatpush3.bf16.msra.mxu1 %v767_v2 }
  0x72   :  { %681 = vmatpush3.bf16.msra.mxu0 %v768_v3 }
 0x127   :  { %v184_v22 = vpop.f32.mrb[0].mxu0  ;;  %v225_v24 = vpop.f32.mrb[0].mxu1 }
 0x128   :  { %v185_v23 = vadd.f32 %v184_v22, %v105_v19  ;;  %v186_v25 = vpop.f32.mrb[1].mxu0  ;;  %v226_v26 = vadd.f32 %v225_v24, %v113_v20  ;;  %v703_v28 = vpop.f32.mrb[1].mxu1  ;;  %v265_v19 = vrot.slane %v993_v13, %v264_v16  ;;  %v261_v20 = vrot.slane %v993_v13, %v260_v14 }
 0x129   :  { %v187_v27 = vadd.f32 %v186_v25, %v109_v21  ;;  %v188_v29 = vpop.f32.mrb[2].mxu0  ;;  %v228_v31 = vpop.f32.mrb[2].mxu1  ;;  %v299_v21 = vrot.slane %v996_v15, %v290_v17  ;;  %v295_v22 = vrot.slane %v993_v13, %v294_v0  ;;  %v284_v24 = vrot.slane %v269_v18, %v260_v14 }
 0x12a   :  { %v1001_v30 = vmax.f32 %v185_v23, 0.0  ;;  %v189_v32 = vpop.f32.mrb[3].mxu0  ;;  %v1003_v33 = vmax.f32 %v226_v26, 0.0  ;;  %v704_v35 = vpop.f32.mrb[3].mxu1  ;;  %v291_v23 = vrot.slane %v993_v13, %v290_v17  ;;  %v280_v25 = vrot.slane %v265_v19, %v260_v14 }
 0x12b   :  { %v1005_v34 = vmax.f32 %v187_v27, 0.0  ;;  %v276_v28 = vrot.slane %v261_v20, %v260_v14  ;;  %v310_v31 = vrot.slane %v295_v22, %v290_v17  ;;  %v314_v32 = vrot.slane %v299_v21, %v290_v17 }
 0x12c   :  { %v238_v36 = vmul.f32 %v1001_v30, %v1001_v30  ;;  %v240_v40 = vmul.f32 %v1003_v33, %v1003_v33  ;;  %v306_v15 = vrot.slane %v291_v23, %v290_v17 }
 0x12d   :  { %v234_v37 = vadd.f32 %v1005_v34, %v1001_v30  ;;  %v239_v38 = vmul.f32 %v1005_v34, %v1005_v34 }
 0x12f   :  { %v235_v39 = vadd.f32 %v234_v37, %v1003_v33  ;;  %v241_v41 = vadd.f32 %v239_v38, %v238_v36 }
 0x131   :  { %236 = vadd.xlane.f32.xlu0 %v235_v39  ;;  %v242_v42 = vadd.f32 %v241_v41, %v240_v40 }
 0x135   :  { %243 = vadd.xlane.f32.xlu0 %v242_v42 }
 0x1be   :  { %v237_v4 = vpop.xlane.xlu0 %236 }
 0x1bf   :  { %v245_v5 = vmul.f32 0.0033333334, %v237_v4 }
 0x1c1   :  { %v247_v7 = vmul.f32 %v245_v5, %v245_v5  ;;  %v250_v26 = vsub.f32 %v1001_v30, %v245_v5  ;;  %v251_v27 = vsub.f32 %v1005_v34, %v245_v5  ;;  %v252_v11 = vsub.f32 %v1003_v33, %v245_v5 }
 0x1c2   :  { %v244_v6 = vpop.xlane.xlu0 %243 }
 0x1c3   :  { %v246_v8 = vmul.f32 0.0033333334, %v244_v6 }
 0x1c5   :  { %v248_v9 = vsub.f32 %v246_v8, %v247_v7 }
 0x1c7   :  { %v249_v10 = vmax.f32 %v248_v9, 0.0 }
 0x1c9   :  { %v253_v12 = vadd.f32 1e-05, %v249_v10 }
 0x1cb   :  { %769 = vrsqrt.f32 %v253_v12 }
 0x1d5   :  { %v770_v29 = vpop.eup %769 }
 0x1d6   :  { %v256_v35 = vmul.f32 %v770_v29, %v251_v27  ;;  %v257_v36 = vmul.f32 %v770_v29, %v252_v11  ;;  %v255_v37 = vmul.f32 %v770_v29, %v250_v26 }
 0x1d8   :  { %v286_v38 = vmul.f32 %v280_v25, %v256_v35  ;;  %v287_v39 = vmul.f32 %v284_v24, %v257_v36  ;;  %v285_v40 = vmul.f32 %v276_v28, %v255_v37 }
 0x1da   :  { %v316_v13 = vadd.f32 %v310_v31, %v286_v38  ;;  %v317_v41 = vadd.f32 %v314_v32, %v287_v39  ;;  %v315_v42 = vadd.f32 %v306_v15, %v285_v40 }
 0x1dc   :  { %v319_v43 = vpack.c.bf16 %v316_v13, %v316_v13  ;;  %v320_v30 = vpack.c.bf16 %v317_v41, %v317_v41  ;;  %v318_v44 = vpack.c.bf16 %v315_v42, %v315_v42 }
 0x1de   :  { %552 = vmatprep.mubr.bf16.mxu0 %v319_v43  ;;  %722 = vmatmul.mubr.bf16.vlgmr.msra.gmra.mrb[4].mxu1 %v320_v30 }
 0x1df   :  { %553 = vmatmul.mubr.bf16.vlgmr.msra.gmra.mrb[4].mxu0 %v318_v44 }
 0x2b1   :  { %v594_v33 = vpop.f32.mrb[4].mxu1 }
 0x2b2   :  { %v682_v34 = vpop.f32.mrb[4].mxu0  ;;  %v723_v45 = vpop.f32.mrb[5].mxu1 }
 0x2b3   :  { %v683_v47 = vpop.f32.mrb[5].mxu0  ;;  %v597_v48 = vpop.f32.mrb[6].mxu1 }
 0x2b4   :  { %v684_v49 = vadd.f32 %v683_v47, %v682_v34  ;;  %v685_v50 = vpop.f32.mrb[6].mxu0  ;;  %v724_v51 = vpop.f32.mrb[7].mxu1 }
 0x2b5   :  { %v686_v52 = vpop.f32.mrb[7].mxu0 }
 0x2b6   :  { %v555_v53 = vadd.f32 %v684_v49, %v638_v46 }
 0x2b8   :  { %v595_v54 = vadd.f32 %v594_v33, %v555_v53 }
 0x2ba   :  { %600 = vmax.xlane.f32.xlu1 %v595_v54 }
 0x347   :  { %v601_v55 = vpop.xlane.xlu1 %600 }
 0x348   :  { %v602_v56 = vsub.f32 %v595_v54, %v601_v55 }
 0x34a   :  { %v603_v57 = vmul.f32 1.442695, %v602_v56 }
 0x34c   :  { %771 = vpow2.f32 %v603_v57 }
 0x356   :  { %v772_v58 = vpop.eup %771 }
 0x357   :  { %605 = vadd.xlane.f32.xlu1 %v772_v58 }
 0x3e4   :  { %v606_v59 = vpop.xlane.xlu1 %605 }
 0x3e5   :  { %773 = vrcp.f32 %v606_v59 }
 0x3ef   :  { %v774_v60 = vpop.eup %773 }
 0x3f0   :  { %v608_v61 = vmul.f32 %v774_v60, %v606_v59 }
 0x3f2   :  { %v609_v62 = vsub.f32 2.0, %v608_v61 }
 0x3f4   :  { %v610_v63 = vmul.f32 %v774_v60, %v609_v62 }
 0x3f6   :  { %v611_v1 = vmul.f32 %v772_v58, %v610_v63 }
 0x3f8   :  { %612 = vst [vmem:[#allocation10] sm:$0xff] %v611_v1 }
 0x3f9   :  { %874 = shalt.err (!%p871_p8)
}
 0x3fa   :  { %s875_s21 = scalar_lea.hbm %s1056_s5, 128 }
 0x3fb   :  { %p876_p9 = scmp.ne.s32.totalorder %s1056_s5, %s875_s21  ;;  %p879_p10 = scmp.lt.u32.totalorder %s875_s21, %s1056_s5 }
 0x3fd   :  { %p881_p11 = pnand %p879_p10, %p876_p9 }
 0x3ff   :  { %884 = shalt.err (!%p881_p11)
}
 0x400   :  { %622 = dma.vmem_to_hbm [thread:$0]  %s620_s1, 128, %s1056_s5, [#allocation4]  }
 0x401   :  { %891 = dma.done.wait [#allocation4], 128  }
 0x402   :  { %892 = vsyncadd [#allocation4], 4294967168 }
 0x403   :  { %626 = vsyncpa [#allocation3], 1 }
 0x404   :  { %627 = vsyncpa [#allocation6], 1 }
 0x405   :  { %628 = vsyncpa [#allocation9], 1 }
 0x406   :  { %629 = vsyncpa [#allocation4], 1 }

</bundles_post_ra>
